<compile_context>
chip_gen: v6e
topology: v6e:2x2x1
jax: 0.10.0
libtpu: 0.0.40
codegen_flags: <defaults>
</compile_context>

<pallas_src>
import functools
import math

import jax
import jax.numpy as jnp
from jax import lax
from jax.experimental import pallas as pl
from jax.experimental.pallas import tpu as pltpu


def _round_up(x, m):
    return ((x + m - 1) // m) * m


def _ntxent_kernel(row_ref, col_ref, out_ref, m_ref, l_ref,
                   *, inv_temp, n_valid, tm, tn):
    i = pl.program_id(0)          # row-stripe index ("parallel")
    j = pl.program_id(1)          # column-tile index (online-LSE reduction, last)
    ncols = pl.num_programs(1)

    # ---- init running max / running sum at the start of each row stripe ----
    @pl.when(j == 0)
    def _():
        m_ref[...] = jnp.full_like(m_ref, -jnp.inf)
        l_ref[...] = jnp.zeros_like(l_ref)

    # (tm, tn) UNSCALED similarity tile on the MXU: bf16 operands, f32 accumulate,
    # contracting the last dims of both operands (no transpose / relayout).
    s = lax.dot_general(row_ref[...], col_ref[...],
                        dimension_numbers=(((1,), (1,)), ((), ())),
                        preferred_element_type=jnp.float32)

    # Single unconditional mask from global indices: self-pairs (diagonal) and
    # padded (out-of-range) columns.  Cheap VALU filler; no scratch round-trip.
    gr = lax.broadcasted_iota(jnp.int32, (tm, tn), 0) + i * tm
    gc = lax.broadcasted_iota(jnp.int32, (tm, tn), 1) + j * tn
    s = jnp.where((gr == gc) | (gc >= n_valid), jnp.float32(-1e30), s)

    # Online logsumexp of the scaled logits s/T while tracking the running max
    # in UNSCALED score space, so 1/T never touches a (tm, Dp) operand.
    m_prev = m_ref[...]
    m_new = jnp.maximum(m_prev, jnp.max(s, axis=-1, keepdims=True))
    alpha = jnp.exp((m_prev - m_new) * inv_temp)
    l_ref[...] = alpha * l_ref[...] + jnp.sum(
        jnp.exp((s - m_new) * inv_temp), axis=-1, keepdims=True)
    m_ref[...] = m_new

    # ---- finalize this row stripe: per-row logsumexp of the scaled logits ----
    @pl.when(j == ncols - 1)
    def _():
        lse = m_ref[...] * inv_temp + jnp.log(l_ref[...])    # (tm, 1)
        out_ref[...] = lse.reshape(1, tm)                    # lane-dense store


def ntxent_loss(zis, zjs, *, batch_size, temperature, use_cosine_similarity,
                row_block=256, col_block=512):
    assert zis.shape == zjs.shape
    n, d = zis.shape
    assert batch_size == n, "batch_size must match zis.shape[0]"
    n2 = 2 * n
    inv_temp = 1.0 / float(temperature)

    # Glue: concat + (optional) L2 normalization for cosine similarity.
    reps = jnp.concatenate([zjs, zis], axis=0).astype(jnp.float32)       # (2N, D)
    if use_cosine_similarity:
        norm = jnp.sqrt(jnp.sum(reps * reps, axis=-1, keepdims=True))
        reps = reps / jnp.maximum(norm, 1e-8)   # matches torch CosineSimilarity eps

    # Positive logit per row, precomputed ONCE in the wrapper (fused O(2N*D) pass)
    # instead of streaming a (2N, Dp) partner array through the kernel.
    # partner[r] = reps[(r + N) % 2N].
    partner = jnp.concatenate([reps[n:], reps[:n]], axis=0)
    pos = jnp.sum(reps * partner, axis=-1) * jnp.float32(inv_temp)       # (2N,)

    # ---- tile selection -----------------------------------------------------
    if n2 <= 128:
        p = _round_up(n2, 16)          # bf16 min sublane granularity
        tm = tn = p                    # single (p, p) tile, grid (1, 1)
    else:
        p = _round_up(n2, 128)
        tm = min(_round_up(row_block, 128), p)   # 128-aligned -> lane-dense output
        tn = min(_round_up(col_block, 128), p)
        lcm = tm * tn // math.gcd(tm, tn)
        p = _round_up(n2, lcm)         # both tile sizes divide the padded extent
    dp = _round_up(d, 128)

    # bf16 MXU operands (native MXU dtype on v5e/v6e/v7x).  Zero padding leaves
    # dot products unchanged; padded columns are masked in-kernel; padded rows
    # are sliced off below.
    reps_p = jnp.zeros((p, dp), jnp.bfloat16).at[:n2, :d].set(
        reps.astype(jnp.bfloat16))

    grid = (p // tm, p // tn)
    kernel = functools.partial(_ntxent_kernel, inv_temp=inv_temp,
                               n_valid=n2, tm=tm, tn=tn)

    lse = pl.pallas_call(
        kernel,
        out_shape=jax.ShapeDtypeStruct((1, p), jnp.float32),
        grid_spec=pltpu.PrefetchScalarGridSpec(
            num_scalar_prefetch=0,
            grid=grid,
            in_specs=[
                pl.BlockSpec((tm, dp), lambda i, j: (i, 0)),   # row stripe of reps
                pl.BlockSpec((tn, dp), lambda i, j: (j, 0)),   # column tile of reps
            ],
            out_specs=pl.BlockSpec((1, tm), lambda i, j: (0, i)),
            scratch_shapes=[
                pltpu.VMEM((tm, 1), jnp.float32),    # running max m
                pltpu.VMEM((tm, 1), jnp.float32),    # running sum l
            ]),
        compiler_params=pltpu.CompilerParams(
            dimension_semantics=("parallel", "arbitrary")),
    )(reps_p, reps_p)

    # CrossEntropy(reduction='sum') with label 0, then / 2N:
    #   loss = mean_r ( logsumexp_c!=r (sim(r,c)/T)  -  sim(r, partner(r))/T )
    return (jnp.sum(lse[0, :n2]) - jnp.sum(pos)) / jnp.float32(n2)


def _ntxent_reference(zis, zjs, *, batch_size, temperature, use_cosine_similarity):
    """Pure-JAX reference mirroring the PyTorch forward."""
    reps = jnp.concatenate([zjs, zis], axis=0).astype(jnp.float32)
    if use_cosine_similarity:
        norm = jnp.linalg.norm(reps, axis=-1, keepdims=True)
        reps = reps / jnp.maximum(norm, 1e-8)
    sim = reps @ reps.T
    n2 = 2 * batch_size
    l_pos = jnp.diagonal(sim, offset=batch_size)
    r_pos = jnp.diagonal(sim, offset=-batch_size)
    positives = jnp.concatenate([l_pos, r_pos]).reshape(n2, 1)
    eye = jnp.eye(n2, dtype=bool)
    k1 = jnp.eye(n2, k=batch_size, dtype=bool)
    k2 = jnp.eye(n2, k=-batch_size, dtype=bool)
    mask = ~(eye | k1 | k2)
    negatives = sim[mask].reshape(n2, -1)
    logits = jnp.concatenate([positives, negatives], axis=1) / temperature
    log_probs = jax.nn.log_softmax(logits, axis=-1)
    loss = -jnp.sum(log_probs[:, 0])
    return loss / n2


if __name__ == "__main__":
    key = jax.random.PRNGKey(0)
    temperature = 0.5

    # --- small config matching the module spec (single-tile path, cosine sim) ---
    batch_size, dim = 4, 32
    k1, k2, k3, k4 = jax.random.split(key, 4)
    zis = jax.random.normal(k1, (batch_size, dim), dtype=jnp.float32)
    zjs = jax.random.normal(k2, (batch_size, dim), dtype=jnp.float32)

    loss = ntxent_loss(zis, zjs, batch_size=batch_size, temperature=temperature,
                       use_cosine_similarity=True)
    loss = jax.block_until_ready(loss)
    ref = _ntxent_reference(zis, zjs, batch_size=batch_size,
                            temperature=temperature, use_cosine_similarity=True)
    assert jnp.allclose(loss, ref, rtol=5e-2, atol=5e-2), (loss, ref)

    # --- same data with raw dot-product similarity ---
    loss_d = ntxent_loss(zis, zjs, batch_size=batch_size, temperature=temperature,
                         use_cosine_similarity=False)
    loss_d = jax.block_until_ready(loss_d)
    ref_d = _ntxent_reference(zis, zjs, batch_size=batch_size,
                              temperature=temperature, use_cosine_similarity=False)
    assert jnp.allclose(loss_d, ref_d, rtol=5e-2, atol=1e-1), (loss_d, ref_d)

    # --- larger config exercising multi-tile grid + online LSE + row/col/D pad ---
    batch_size2, dim2 = 96, 200     # 2N=192 -> P=256, tm=tn=128, 2x2 grid
    zis2 = jax.random.normal(k3, (batch_size2, dim2), dtype=jnp.float32)
    zjs2 = jax.random.normal(k4, (batch_size2, dim2), dtype=jnp.float32)
    loss2 = ntxent_loss(zis2, zjs2, batch_size=batch_size2,
                        temperature=temperature, use_cosine_similarity=True,
                        row_block=128, col_block=128)
    loss2 = jax.block_until_ready(loss2)
    ref2 = _ntxent_reference(zis2, zjs2, batch_size=batch_size2,
                             temperature=temperature, use_cosine_similarity=True)
    assert jnp.allclose(loss2, ref2, rtol=5e-2, atol=5e-2), (loss2, ref2)

    print("KERNEL_OK")
</pallas_src>

<mosaic_0001>
module attributes {stable_mosaic.version = 11 : i64} {
  func.func @_ntxent_kernel(%arg0: i32, %arg1: i32, %arg2: memref<16x128xbf16, #tpu.memory_space<vmem>>, %arg3: memref<16x128xbf16, #tpu.memory_space<vmem>>, %arg4: memref<1x16xf32, #tpu.memory_space<vmem>>, %arg5: memref<16x1xf32, #tpu.memory_space<vmem>>, %arg6: memref<16x1xf32, #tpu.memory_space<vmem>>) attributes {dimension_semantics = [#tpu.dimension_semantics<parallel>, #tpu.dimension_semantics<arbitrary>], iteration_bounds = array<i64: 1, 1>, scalar_prefetch = 0 : i64, scratch_operands = 2 : i64, tpu.core_type = #tpu.core_type<tc>, window_params = [{transform_indices = @transform_0, window_bounds = array<i64: 16, 128>}, {transform_indices = @transform_1, window_bounds = array<i64: 16, 128>}, {transform_indices = @transform_2, window_bounds = array<i64: 1, 16>}]} {
    %c0_i32 = arith.constant 0 : i32
    %0 = arith.cmpi eq, %arg1, %c0_i32 : i32
    %1 = arith.extui %0 : i1 to i32
    %c0_i32_0 = arith.constant 0 : i32
    %2 = arith.cmpi ne, %1, %c0_i32_0 : i32
    scf.if %2 {
      %cst_20 = arith.constant 0xFF800000 : f32
      %43 = vector.broadcast %cst_20 : f32 to vector<16x1xf32>
      %c0_21 = arith.constant 0 : index
      %c0_22 = arith.constant 0 : index
      %44 = vector.load %arg5[%c0_21, %c0_22] : memref<16x1xf32, #tpu.memory_space<vmem>>, vector<16x1xf32>
      tpu.vector_store %arg5[%c0_21, %c0_22], %43 {strides = array<i32>} : memref<16x1xf32, #tpu.memory_space<vmem>>, vector<16x1xf32>,
      %cst_23 = arith.constant 0.000000e+00 : f32
      %45 = vector.broadcast %cst_23 : f32 to vector<16x1xf32>
      %c0_24 = arith.constant 0 : index
      %c0_25 = arith.constant 0 : index
      %46 = vector.load %arg6[%c0_24, %c0_25] : memref<16x1xf32, #tpu.memory_space<vmem>>, vector<16x1xf32>
      tpu.vector_store %arg6[%c0_24, %c0_25], %45 {strides = array<i32>} : memref<16x1xf32, #tpu.memory_space<vmem>>, vector<16x1xf32>,
    } else {
    }
    %c0 = arith.constant 0 : index
    %c0_1 = arith.constant 0 : index
    %3 = vector.load %arg2[%c0, %c0_1] : memref<16x128xbf16, #tpu.memory_space<vmem>>, vector<16x128xbf16>
    %c0_2 = arith.constant 0 : index
    %c0_3 = arith.constant 0 : index
    %4 = vector.load %arg3[%c0_2, %c0_3] : memref<16x128xbf16, #tpu.memory_space<vmem>>, vector<16x128xbf16>
    %cst = arith.constant dense<0.000000e+00> : vector<16x16xf32>
    %5 = tpu.matmul %3, %4, %cst {dimension_numbers = #tpu.dot_dimension_numbers<[1], [1], [0], [0], [0, 0, 1, 0], [], []>} : vector<16x128xbf16>, vector<16x128xbf16>, vector<16x16xf32> -> vector<16x16xf32>
    %6 = tpu.iota {dimensions = array<i32: 0>} : vector<16x16xi32>
    %c16_i32 = arith.constant 16 : i32
    %7 = arith.muli %arg0, %c16_i32 : i32
    %8 = vector.broadcast %7 : i32 to vector<16x16xi32>
    %9 = arith.addi %6, %8 : vector<16x16xi32>
    %10 = tpu.iota {dimensions = array<i32: 1>} : vector<16x16xi32>
    %c16_i32_4 = arith.constant 16 : i32
    %11 = arith.muli %arg1, %c16_i32_4 : i32
    %12 = vector.broadcast %11 : i32 to vector<16x16xi32>
    %13 = arith.addi %10, %12 : vector<16x16xi32>
    %14 = arith.cmpi eq, %9, %13 : vector<16x16xi32>
    %c8_i32 = arith.constant 8 : i32
    %15 = vector.broadcast %c8_i32 : i32 to vector<16x16xi32>
    %16 = arith.cmpi sge, %13, %15 : vector<16x16xi32>
    %17 = arith.ori %14, %16 : vector<16x16xi1>
    %cst_5 = arith.constant -1.000000e+30 : f32
    %18 = vector.broadcast %cst_5 : f32 to vector<16x16xf32>
    %19 = arith.select %17, %18, %5 : vector<16x16xi1>, vector<16x16xf32>
    %c0_6 = arith.constant 0 : index
    %c0_7 = arith.constant 0 : index
    %20 = vector.load %arg5[%c0_6, %c0_7] : memref<16x1xf32, #tpu.memory_space<vmem>>, vector<16x1xf32>
    %cst_8 = arith.constant dense<0xFF800000> : vector<16xf32>
    %21 = vector.multi_reduction <maximumf>, %19, %cst_8 [1] : vector<16x16xf32> to vector<16xf32>
    %22 = vector.shape_cast %21 : vector<16xf32> to vector<16x1xf32>
    %23 = arith.maximumf %20, %22 : vector<16x1xf32>
    %24 = arith.subf %20, %23 : vector<16x1xf32>
    %cst_9 = arith.constant 2.000000e+00 : f32
    %25 = vector.broadcast %cst_9 : f32 to vector<16x1xf32>
    %26 = arith.mulf %24, %25 : vector<16x1xf32>
    %27 = math.exp %26 : vector<16x1xf32>
    %c0_10 = arith.constant 0 : index
    %c0_11 = arith.constant 0 : index
    %28 = vector.load %arg6[%c0_10, %c0_11] : memref<16x1xf32, #tpu.memory_space<vmem>>, vector<16x1xf32>
    %29 = arith.mulf %27, %28 : vector<16x1xf32>
    %30 = vector.broadcast %23 : vector<16x1xf32> to vector<16x16xf32>
    %31 = arith.subf %19, %30 : vector<16x16xf32>
    %cst_12 = arith.constant 2.000000e+00 : f32
    %32 = vector.broadcast %cst_12 : f32 to vector<16x16xf32>
    %33 = arith.mulf %31, %32 : vector<16x16xf32>
    %34 = math.exp %33 : vector<16x16xf32>
    %cst_13 = arith.constant dense<0.000000e+00> : vector<16xf32>
    %35 = vector.multi_reduction <add>, %34, %cst_13 [1] : vector<16x16xf32> to vector<16xf32>
    %36 = vector.shape_cast %35 : vector<16xf32> to vector<16x1xf32>
    %37 = arith.addf %29, %36 : vector<16x1xf32>
    %c0_14 = arith.constant 0 : index
    %c0_15 = arith.constant 0 : index
    %38 = vector.load %arg6[%c0_14, %c0_15] : memref<16x1xf32, #tpu.memory_space<vmem>>, vector<16x1xf32>
    tpu.vector_store %arg6[%c0_14, %c0_15], %37 {strides = array<i32>} : memref<16x1xf32, #tpu.memory_space<vmem>>, vector<16x1xf32>,
    %c0_16 = arith.constant 0 : index
    %c0_17 = arith.constant 0 : index
    %39 = vector.load %arg5[%c0_16, %c0_17] : memref<16x1xf32, #tpu.memory_space<vmem>>, vector<16x1xf32>
    tpu.vector_store %arg5[%c0_16, %c0_17], %23 {strides = array<i32>} : memref<16x1xf32, #tpu.memory_space<vmem>>, vector<16x1xf32>,
    %c0_i32_18 = arith.constant 0 : i32
    %40 = arith.cmpi eq, %arg1, %c0_i32_18 : i32
    %41 = arith.extui %40 : i1 to i32
    %c0_i32_19 = arith.constant 0 : i32
    %42 = arith.cmpi ne, %41, %c0_i32_19 : i32
    scf.if %42 {
      %c0_20 = arith.constant 0 : index
      %c0_21 = arith.constant 0 : index
      %43 = vector.load %arg5[%c0_20, %c0_21] : memref<16x1xf32, #tpu.memory_space<vmem>>, vector<16x1xf32>
      %cst_22 = arith.constant 2.000000e+00 : f32
      %44 = vector.broadcast %cst_22 : f32 to vector<16x1xf32>
      %45 = arith.mulf %43, %44 : vector<16x1xf32>
      %c0_23 = arith.constant 0 : index
      %c0_24 = arith.constant 0 : index
      %46 = vector.load %arg6[%c0_23, %c0_24] : memref<16x1xf32, #tpu.memory_space<vmem>>, vector<16x1xf32>
      %47 = math.log %46 : vector<16x1xf32>
      %48 = arith.addf %45, %47 : vector<16x1xf32>
      %49 = vector.shape_cast %48 : vector<16x1xf32> to vector<1x16xf32>
      %c0_25 = arith.constant 0 : index
      %c0_26 = arith.constant 0 : index
      %50 = vector.load %arg4[%c0_25, %c0_26] : memref<1x16xf32, #tpu.memory_space<vmem>>, vector<1x16xf32>
      tpu.vector_store %arg4[%c0_25, %c0_26], %49 {strides = array<i32>} : memref<1x16xf32, #tpu.memory_space<vmem>>, vector<1x16xf32>,
    } else {
    }
    return
  }
  func.func @transform_0(%arg0: i32, %arg1: i32) -> (i32, i32) {
    %c0_i32 = arith.constant 0 : i32
    %c0_i32_0 = arith.constant 0 : i32
    return %arg0, %c0_i32 : i32, i32
  }
  func.func @transform_1(%arg0: i32, %arg1: i32) -> (i32, i32) {
    %c0_i32 = arith.constant 0 : i32
    %c0_i32_0 = arith.constant 0 : i32
    return %arg1, %c0_i32 : i32, i32
  }
  func.func @transform_2(%arg0: i32, %arg1: i32) -> (i32, i32) {
    %c0_i32 = arith.constant 0 : i32
    %c0_i32_0 = arith.constant 0 : i32
    return %c0_i32, %arg0 : i32, i32
  }
}

</mosaic_0001>

<bundles_post_ra>
// kernel: tpu_custom_call.1
= control target key start
LH: loop header
LB: loop body
LE: loop exit
PB: predicated region body
PF: predicated region fallthrough
CT: control target
= control target key end

     0   :  { %7 = vsyncpa [#allocation5], 0  ;;  %s392_s0 = inlined_call_operand.hbm [shape: bf16[16,128], index: 0, kind: input, shape index: {}]   ;;  %s393_s1 = inlined_call_operand.hbm [shape: bf16[16,128], index: 1, kind: input, shape index: {}]   ;;  %s394_s2 = inlined_call_operand.hbm [shape: f32[1,16], index: 2, kind: output, shape index: {}]  }
   0x1   :  { %8 = vsyncpa [#allocation8], 0 }
   0x2   :  { %9 = vsyncpa [#allocation6], 0  ;;  %s334_s9 = smov [#allocation4]  }
   0x3   :  { %s15_s10 = sshll.u32 %s334_s9, 4  ;;  %s16_s10 = int_to_ptr.vmem [resolvable:$true] %s15_s10 }
   0x4   :  { %s276_s11 = scalar_lea.vmem %s16_s10, 128  ;;  %p281_p1 = scmp.lt.s32.totalorder %s16_s10, %s16_s10 }
   0x5   :  { %p277_p0 = scmp.ne.s32.totalorder %s16_s10, %s276_s11  ;;  %p282_p2 = scmp.lt.s32.totalorder %s276_s11, %s276_s11 }
   0x7   :  { %p283_p3 = por %p282_p2, %p281_p1 }
   0x9   :  { %p284_p4 = pnand %p283_p3, %p277_p0 }
   0xb   :  { %287 = shalt.err (!%p284_p4)
}
   0xc   :  { %s335_s12 = smov 64   ;;  %s336_s13 = smov 4  }
   0xd   :  { %21 = dma.hbm_to_vmem [thread:$0]  %s392_s0, 128, %s16_s10, [#allocation5], %s335_s12, %s335_s12, %s336_s13  }
   0xe   :  { %s337_s16 = smov [#allocation7]  }
   0xf   :  { %s27_s17 = sshll.u32 %s337_s16, 4  ;;  %s28_s17 = int_to_ptr.vmem [resolvable:$true] %s27_s17 }
  0x10   :  { %s296_s18 = scalar_lea.vmem %s28_s17, 128  ;;  %p301_p6 = scmp.lt.s32.totalorder %s28_s17, %s28_s17 }
  0x11   :  { %p297_p5 = scmp.ne.s32.totalorder %s28_s17, %s296_s18  ;;  %p302_p7 = scmp.lt.s32.totalorder %s296_s18, %s296_s18 }
  0x13   :  { %p303_p8 = por %p302_p7, %p301_p6 }
  0x15   :  { %p304_p9 = pnand %p303_p8, %p297_p5 }
  0x17   :  { %307 = shalt.err (!%p304_p9)
}
  0x18   :  { %33 = dma.hbm_to_vmem [thread:$0]  %s393_s1, 128, %s28_s17, [#allocation8], %s335_s12, %s335_s12, %s336_s13  }
  0x19   :  { %328 = dma.done.wait [#allocation5], 128  }
  0x1a   :  { %329 = vsyncadd [#allocation5], 4294967168 }
  0x1b   :  { %330 = dma.done.wait [#allocation8], 128  }
  0x1c   :  { %331 = vsyncadd [#allocation8], 4294967168  ;;  %vm45_vm0 = vcmask 7168   ;;  %v338_v0 = vmov 0.0   ;;  %vm339_vm1 = vmmov 0   ;;  %v254_v1 = vld [vmem:[#allocation7] sm:$0xff]   ;;  %v107_v4 = vlaneseq }
  0x1d   :  { %48 = vst.msk [vmem:[#allocation3] sm:$0xff] %vm45_vm0, %v338_v0  ;;  %49 = vst.msk [vmem:[#allocation3 + $0x8] sm:$0xff] %vm45_vm0, %v338_v0  ;;  %237 = vmatprep.subr.bf16.mxu0 %v338_v0  ;;  %239 = vmatprep.mubr.msk.bf16.mxu0 %vm339_vm1, %v338_v0  ;;  %v255_v2 = vld [vmem:[#allocation4] sm:$0xff]   ;;  %v340_v3 = vmov -inf   ;;  %vm128_vm5 = vcmask 130048   ;;  %v341_v16 = vmov 0  }
  0x1e   :  { %238 = vmatpush3.bf16.xpose.msra.mxu0 %v254_v1  ;;  %46 = vst.msk [vmem:[#allocation2] sm:$0xff] %vm45_vm0, %v340_v3  ;;  %47 = vst.msk [vmem:[#allocation2 + $0x8] sm:$0xff] %vm45_vm0, %v340_v3  ;;  %v368_v5 = vshrl.u32 %v107_v4, 7  ;;  %v370_v6 = vand.u32 127, %v107_v4  ;;  %252 = vset.pattern.permute.xlu1 %v341_v16  ;;  %s342_s0 = smov [#allocation9]   ;;  %vm212_vm8 = vcmask 130112  }
  0x1f   :  { %253 = vset.pattern.permute.xlu0 %v341_v16  ;;  %s223_s1 = sshll.u32 %s342_s0, 4  ;;  %vm215_vm9 = vcmask 122880   ;;  %s224_s1 = int_to_ptr.vmem [resolvable:$true] %s223_s1 }
  0x20   :  { %vm119_vm2 = vcmp.eq.s32.totalorder %v368_v5, %v370_v6  ;;  %vm121_vm3 = vcmp.ge.s32.totalorder %v370_v6, 8  ;;  %v109_v7 = vadd.s32 8, %v368_v5  ;;  %v207_v63 = vadd.s32 4294967288, %v370_v6  ;;  %s308_s21 = scalar_lea.vmem %s224_s1, 16  ;;  %s312_s22 = scalar_lea.vmem %s224_s1, 32 }
  0x21   :  { %vm122_vm4 = vmor %vm119_vm2, %vm121_vm3  ;;  %v205_v0 = vsub.s32 %v370_v6, %v368_v5  ;;  %p309_p10 = scmp.ne.s32.totalorder %s224_s1, %s308_s21  ;;  %p313_p11 = scmp.lt.s32.totalorder %s224_s1, %s224_s1 }
  0x22   :  { %vm120_vm6 = vcmp.eq.s32.totalorder %v109_v7, %v370_v6  ;;  %v210_v1 = vsub.s32 %v207_v63, %v368_v5  ;;  %p314_p12 = scmp.lt.s32.totalorder %s312_s22, %s308_s21 }
  0x23   :  { %vm123_vm7 = vmor %vm120_vm6, %vm121_vm3 }
  0x24   :  { %v145_v42 = vld [vmem:[#allocation3] sm:$0xff]  ;;  %v146_v46 = vld [vmem:[#allocation3 + $0x8] sm:$0xff]  ;;  %p315_p13 = por %p314_p12, %p313_p11 }
  0x25   :  { %240 = vmatmul.mubr.bf16.vlgmr.msra.gmra.mxu0 %v255_v2  ;;  %v126_v17 = vld [vmem:[#allocation2] sm:$0xff]  ;;  %v127_v20 = vld [vmem:[#allocation2 + $0x8] sm:$0xff] }
  0x26   :  { %p316_p0 = pnand %p315_p13, %p309_p10 }
  0xe5   :  { %v100_v8 = vpop.f32.mrf.mxu0 }
  0xe6   :  { %v124_v9 = vsel %vm122_vm4, -1e+30, %v100_v8 }
  0xe7   :  { %v241_v10 = vpop.f32.mrf.mxu0  ;;  %v129_v11 = vsel %vm128_vm5, %v124_v9, -inf }
  0xe8   :  { %130 = vmax.xlane.f32.xlu0 %v129_v11 }
  0xe9   :  { %v103_v12 = vpop.f32.mrf.mxu0 }
  0xea   :  { %v125_v13 = vsel %vm123_vm7, -1e+30, %v103_v12 }
  0xeb   :  { %v242_v14 = vpop.f32.mrf.mxu0  ;;  %v132_v15 = vsel %vm128_vm5, %v125_v13, -inf }
  0xec   :  { %133 = vmax.xlane.f32.xlu0 %v132_v15 }
 0x171   :  { %v131_v18 = vpop.xlane.xlu0 %130 }
 0x172   :  { %v135_v19 = vmax.f32 %v126_v17, %v131_v18 }
 0x174   :  { %v137_v21 = vsub.f32 %v126_v17, %v135_v19  ;;  %178 = vst.msk [vmem:[#allocation2] sm:$0xff] %vm45_vm0, %v135_v19  ;;  %151 = vperm.xlu1 %252, %v135_v19  }
 0x175   :  { %v134_v22 = vpop.xlane.xlu0 %133 }
 0x176   :  { %v136_v23 = vmax.f32 %v127_v20, %v134_v22  ;;  %v139_v37 = vmul.f32 2.0, %v137_v21 }
 0x178   :  { %v138_v24 = vsub.f32 %v127_v20, %v136_v23  ;;  %179 = vst.msk [vmem:[#allocation2 + $0x8] sm:$0xff] %vm45_vm0, %v136_v23  ;;  %156 = vperm.xlu1 %252, %v136_v23   ;;  %v141_v38 = vmul.f32 1.442695, %v139_v37 }
 0x17a   :  { %v140_v39 = vmul.f32 2.0, %v138_v24 }
 0x17b   :  { %v183_v53 = vld [vmem:[#allocation2] sm:$0xff] }
 0x17c   :  { %v143_v40 = vmul.f32 1.442695, %v140_v39  ;;  %v185_v55 = vmul.f32 2.0, %v183_v53 }
 0x17f   :  { %v184_v57 = vld [vmem:[#allocation2 + $0x8] sm:$0xff] }
 0x180   :  { %v186_v60 = vmul.f32 2.0, %v184_v57 }
 0x1ef   :  { %v152_v25 = vpop.permute.xlu1 %151 }
 0x1f0   :  { %v159_v26 = vsub.f32 %v124_v9, %v152_v25 }
 0x1f2   :  { %v161_v27 = vmul.f32 2.0, %v159_v26 }
 0x1f3   :  { %v157_v28 = vpop.permute.xlu1 %156 }
 0x1f4   :  { %v163_v29 = vmul.f32 1.442695, %v161_v27  ;;  %v160_v30 = vsub.f32 %v125_v13, %v157_v28 }
 0x1f6   :  { %256 = vpow2.f32 %v163_v29  ;;  %v162_v31 = vmul.f32 2.0, %v160_v30 }
 0x1f8   :  { %v165_v32 = vmul.f32 1.442695, %v162_v31 }
 0x1fa   :  { %258 = vpow2.f32 %v165_v32 }
 0x1fb   :  { %260 = vpow2.f32 %v141_v38 }
 0x1fc   :  { %262 = vpow2.f32 %v143_v40 }
 0x203   :  { %v257_v33 = vpop.eup %256 }
 0x204   :  { %v167_v34 = vsel %vm128_vm5, %v257_v33, 0.0 }
 0x205   :  { %168 = vadd.xlane.f32.xlu0 %v167_v34 }
 0x207   :  { %v259_v35 = vpop.eup %258 }
 0x208   :  { %v170_v36 = vsel %vm128_vm5, %v259_v35, 0.0  ;;  %v261_v41 = vpop.eup %260 }
 0x209   :  { %171 = vadd.xlane.f32.xlu1 %v170_v36  ;;  %v147_v43 = vmul.f32 %v261_v41, %v145_v42  ;;  %v263_v44 = vpop.eup %262 }
 0x20a   :  { %v148_v48 = vmul.f32 %v263_v44, %v146_v46 }
 0x28e   :  { %v169_v45 = vpop.xlane.xlu0 %168 }
 0x28f   :  { %v173_v47 = vadd.f32 %v169_v45, %v147_v43 }
 0x291   :  { %176 = vst.msk [vmem:[#allocation3] sm:$0xff] %vm45_vm0, %v173_v47 }
 0x292   :  { %v172_v49 = vpop.xlane.xlu1 %171 }
 0x293   :  { %v174_v50 = vadd.f32 %v172_v49, %v148_v48 }
 0x295   :  { %177 = vst.msk [vmem:[#allocation3 + $0x8] sm:$0xff] %vm45_vm0, %v174_v50 }
 0x298   :  { %v187_v51 = vld [vmem:[#allocation3] sm:$0xff] }
 0x299   :  { %264 = vlog2.f32 %v187_v51 }
 0x29c   :  { %v188_v52 = vld [vmem:[#allocation3 + $0x8] sm:$0xff] }
 0x29d   :  { %266 = vlog2.f32 %v188_v52 }
 0x2a6   :  { %v265_v54 = vpop.eup %264 }
 0x2a7   :  { %v190_v56 = vmul.f32 0.6931472, %v265_v54 }
 0x2a9   :  { %v193_v58 = vadd.f32 %v190_v56, %v185_v55 }
 0x2aa   :  { %v267_v59 = vpop.eup %266 }
 0x2ab   :  { %198 = vperm.xlu0 %253, %v193_v58   ;;  %v192_v61 = vmul.f32 0.6931472, %v267_v59 }
 0x2ad   :  { %v194_v62 = vadd.f32 %v192_v61, %v186_v60 }
 0x2af   :  { %201 = vperm.xlu1 %252, %v194_v62  }
 0x326   :  { %v199_v2 = vpop.permute.xlu0 %198 }
 0x327   :  { %v206_v4 = vrot.slane %v199_v2, %v205_v0 }
 0x32a   :  { %v202_v3 = vpop.permute.xlu1 %201 }
 0x32b   :  { %v211_v7 = vrot.slane %v202_v3, %v210_v1 }
 0x32d   :  { %v213_v8 = vsel %vm212_vm8, %v211_v7, %v206_v4 }
 0x32e   :  { %216 = vst.msk [vmem:[#allocation9] sm:$0x1] %vm215_vm9, %v213_v8 }
 0x32f   :  { %319 = shalt.err (!%p316_p0)
}
 0x330   :  { %226 = dma.vmem_to_hbm [thread:$0]  %s224_s1, 16, %s394_s2, [#allocation6]  }
 0x331   :  { %332 = dma.done.wait [#allocation6], 16  }
 0x332   :  { %333 = vsyncadd [#allocation6], 4294967280 }
 0x333   :  { %230 = vsyncpa [#allocation5], 1 }
 0x334   :  { %231 = vsyncpa [#allocation8], 1 }
 0x335   :  { %232 = vsyncpa [#allocation6], 1 }

</bundles_post_ra>
